<compile_context>
chip_gen: v6e
topology: v6e:2x2x1
jax: 0.10.0
libtpu: 0.0.40
codegen_flags: <defaults>
</compile_context>

<pallas_src>
import math
import numpy as np
import jax
import jax.numpy as jnp
from jax import lax
from jax.experimental import pallas as pl
from jax.experimental.pallas import tpu as pltpu

# ---------------------------------------------------------------------------
# Model hyper-parameters (small, consistent with the module's __init__)
# ---------------------------------------------------------------------------
HIDDEN = 32
NUM_HEADS = 4
KERNEL_SIZE = 3
BATCH = 2
TIME = 8
LN_EPS = 1e-5


def _layer_norm(v, gamma, beta):
    mu = jnp.mean(v, axis=-1, keepdims=True)
    var = jnp.mean((v - mu) ** 2, axis=-1, keepdims=True)
    return (v - mu) * lax.rsqrt(var + LN_EPS) * gamma + beta


# ---------------------------------------------------------------------------
# Pallas kernel factory: one grid step == the whole (B, T, H) batch tile
# ---------------------------------------------------------------------------
def _make_kernel(bb, t, h):
    nh = NUM_HEADS
    dh = h // nh
    n = bb * t  # rows of the flattened slab

    def kernel(x_ref, wqkv_ref, bqkv_ref, wo_ref, bo_ref,
               g1_ref, b1_ref, cwf_ref, cb_ref, g2_ref, b2_ref, o_ref):
        x2d = x_ref[...].reshape(n, h)                          # (B*T, H)

        # ---- fused Q/K/V projection (scale pre-folded into the Q columns) --
        qkv = jnp.dot(x2d, wqkv_ref[...],
                      preferred_element_type=jnp.float32) + bqkv_ref[...]

        # Per-head lane masks for the block-diagonal V trick (batch-invariant,
        # hoisted out of the batch loop).
        lane = lax.broadcasted_iota(jnp.int32, (t, h), 1)
        head_masks = [(lane >= hd * dh) & (lane < (hd + 1) * dh)
                      for hd in range(nh)]

        # ---- per-batch softmax attention, assembled fully in registers -----
        attn_rows = []
        for b in range(bb):
            rs = slice(b * t, (b + 1) * t)
            qb = qkv[rs, 0:h]                                   # (T, H) scaled
            kb = qkv[rs, h:2 * h]
            vb = qkv[rs, 2 * h:3 * h]

            # Per-head scores: K consumed untransposed (contract last axes),
            # so no XLU transpose per head.
            p_blocks = []
            for hd in range(nh):
                cs = slice(hd * dh, (hd + 1) * dh)
                s = lax.dot_general(qb[:, cs], kb[:, cs],
                                    dimension_numbers=(((1,), (1,)), ((), ())),
                                    preferred_element_type=jnp.float32)
                s = s - jnp.max(s, axis=-1, keepdims=True)
                p = jnp.exp(s)
                p = p / jnp.sum(p, axis=-1, keepdims=True)      # exact (tol 1e-4)
                p_blocks.append(p)                              # (T, T)
            p_all = jnp.concatenate(p_blocks, axis=1)           # (T, nh*T)

            # Block-diagonal V: one (T, nh*T)x(nh*T, H) matmul replaces nh tiny
            # PV dots and already places each head at its lane offset.
            v_bd = jnp.concatenate(
                [jnp.where(head_masks[hd], vb, 0.0) for hd in range(nh)],
                axis=0)                                         # (nh*T, H)
            attn_rows.append(jnp.dot(p_all, v_bd,
                                     preferred_element_type=jnp.float32))

        attn = attn_rows[0] if bb == 1 else jnp.concatenate(attn_rows, axis=0)
        attn = jnp.dot(attn, wo_ref[...],
                       preferred_element_type=jnp.float32) + bo_ref[...]

        # dropout1: identity (eval mode)
        x1 = _layer_norm(x2d + attn, g1_ref[...], b1_ref[...])  # (B*T, H)

        # ---- Conv1d over time (same padding) -------------------------------
        # Time-shift the whole slab once (2 rolls + 2 masked selects total);
        # per-batch boundary rows are zeroed via (row % T) masks, so there is
        # no cross-batch leakage. Taps stacked along lanes -> one (n,3H)x(3H,H)
        # MXU pass.
        tpos = lax.broadcasted_iota(jnp.int32, (n, h), 0) % t
        x_prev = jnp.where(tpos >= 1, pltpu.roll(x1, shift=1, axis=0), 0.0)
        x_next = jnp.where(tpos <= t - 2,
                           pltpu.roll(x1, shift=n - 1, axis=0), 0.0)
        taps = jnp.concatenate([x_prev, x1, x_next], axis=-1)   # (B*T, 3H)

        y = jnp.dot(taps, cwf_ref[...],
                    preferred_element_type=jnp.float32) + cb_ref[...]
        y = jnp.maximum(y, 0.0)                                 # ReLU
        # dropout2: identity (eval mode)

        x2 = _layer_norm(x1 + y, g2_ref[...], b2_ref[...])
        o_ref[...] = x2.reshape(bb, t, h)

    return kernel


# ---------------------------------------------------------------------------
# One-time parameter preparation (hoisted out of the hot path)
# ---------------------------------------------------------------------------
def prepare_params(p):
    """Fuse QKV weights/biases (with the 1/sqrt(dh) scale folded into Q) and
    flatten the conv taps. Call once; not on the per-step hot path."""
    scale = 1.0 / math.sqrt(HIDDEN // NUM_HEADS)
    wqkv = jnp.concatenate([p["wq"] * scale, p["wk"], p["wv"]], axis=1)  # (H,3H)
    bqkv = jnp.concatenate([p["bq"] * scale, p["bk"], p["bv"]], axis=1)  # (1,3H)
    cwf = p["cw"].reshape(KERNEL_SIZE * HIDDEN, HIDDEN)                  # (3H,H)
    return (wqkv, bqkv, p["wo"], p["bo"], p["g1"], p["b1"],
            cwf, p["cb"], p["g2"], p["b2"])


# ---------------------------------------------------------------------------
# Wrapper
# ---------------------------------------------------------------------------
def fft_block(x, consts):
    B, T, H = x.shape
    bb = B                      # whole batch in one grid step on all chips
    grid = (1,)

    def const_spec(shape):
        nd = len(shape)
        return pl.BlockSpec(shape, lambda i, _nd=nd: (0,) * _nd)

    in_specs = [pl.BlockSpec((bb, T, H), lambda i: (i, 0, 0))] + [
        const_spec(c.shape) for c in consts
    ]

    return pl.pallas_call(
        _make_kernel(bb, T, H),
        out_shape=jax.ShapeDtypeStruct((B, T, H), jnp.float32),
        grid_spec=pltpu.PrefetchScalarGridSpec(
            num_scalar_prefetch=0,
            grid=grid,
            in_specs=in_specs,
            out_specs=pl.BlockSpec((bb, T, H), lambda i: (i, 0, 0)),
        ),
        compiler_params=pltpu.CompilerParams(
            dimension_semantics=("arbitrary",)),
    )(x, *consts)


# ---------------------------------------------------------------------------
# Pure-JAX reference (mirrors PyTorch eval-mode semantics)
# ---------------------------------------------------------------------------
def fft_block_ref(x, p):
    B, T, H = x.shape
    nh, dh = NUM_HEADS, H // NUM_HEADS
    q = (x @ p["wq"] + p["bq"]).reshape(B, T, nh, dh) / math.sqrt(dh)
    k = (x @ p["wk"] + p["bk"]).reshape(B, T, nh, dh)
    v = (x @ p["wv"] + p["bv"]).reshape(B, T, nh, dh)
    s = jnp.einsum("bqhd,bkhd->bhqk", q, k)
    a = jnp.einsum("bhqk,bkhd->bqhd", jax.nn.softmax(s, axis=-1), v).reshape(B, T, H)
    a = a @ p["wo"] + p["bo"]
    x1 = _layer_norm(x + a, p["g1"], p["b1"])

    xpad = jnp.pad(x1, ((0, 0), (1, 1), (0, 0)))
    y = sum(xpad[:, kk:kk + T] @ p["cw"][kk] for kk in range(KERNEL_SIZE)) + p["cb"]
    y = jnp.maximum(y, 0.0)
    return _layer_norm(x1 + y, p["g2"], p["b2"])


# ---------------------------------------------------------------------------
# Deterministic parameter init (synthetic; equivalent shapes to nn.Module)
# ---------------------------------------------------------------------------
def init_params(key, H, K):
    ks = jax.random.split(key, 16)
    n = lambda k, shape, s=0.05: (s * jax.random.normal(k, shape)).astype(jnp.float32)
    return {
        "wq": n(ks[0], (H, H)), "wk": n(ks[1], (H, H)), "wv": n(ks[2], (H, H)),
        "bq": n(ks[3], (1, H)), "bk": n(ks[4], (1, H)), "bv": n(ks[5], (1, H)),
        "wo": n(ks[6], (H, H)), "bo": n(ks[7], (1, H)),
        "g1": (1.0 + 0.1 * jax.random.normal(ks[8], (1, H))).astype(jnp.float32),
        "b1": n(ks[9], (1, H)),
        "cw": n(ks[10], (K, H, H)),   # per-tap (H_in, H_out) matrices
        "cb": n(ks[11], (1, H)),
        "g2": (1.0 + 0.1 * jax.random.normal(ks[12], (1, H))).astype(jnp.float32),
        "b2": n(ks[13], (1, H)),
    }


if __name__ == "__main__":
    key = jax.random.PRNGKey(0)
    kx, kp = jax.random.split(key)
    x = jax.random.normal(kx, (BATCH, TIME, HIDDEN), dtype=jnp.float32)
    params = init_params(kp, HIDDEN, KERNEL_SIZE)

    consts = prepare_params(params)               # one-time fusion, off hot path
    out = jax.block_until_ready(fft_block(x, consts))
    ref = jax.block_until_ready(fft_block_ref(x, params))
    np.testing.assert_allclose(np.asarray(out), np.asarray(ref), rtol=1e-4, atol=1e-4)

    print("KERNEL_OK")
</pallas_src>

<mosaic_0001>
module attributes {stable_mosaic.version = 11 : i64} {
  func.func @kernel(%arg0: i32, %arg1: memref<2x8x32xf32, #tpu.memory_space<vmem>>, %arg2: memref<32x96xf32, #tpu.memory_space<vmem>>, %arg3: memref<1x96xf32, #tpu.memory_space<vmem>>, %arg4: memref<32x32xf32, #tpu.memory_space<vmem>>, %arg5: memref<1x32xf32, #tpu.memory_space<vmem>>, %arg6: memref<1x32xf32, #tpu.memory_space<vmem>>, %arg7: memref<1x32xf32, #tpu.memory_space<vmem>>, %arg8: memref<96x32xf32, #tpu.memory_space<vmem>>, %arg9: memref<1x32xf32, #tpu.memory_space<vmem>>, %arg10: memref<1x32xf32, #tpu.memory_space<vmem>>, %arg11: memref<1x32xf32, #tpu.memory_space<vmem>>, %arg12: memref<2x8x32xf32, #tpu.memory_space<vmem>>) attributes {dimension_semantics = [#tpu.dimension_semantics<arbitrary>], iteration_bounds = array<i64: 1>, scalar_prefetch = 0 : i64, scratch_operands = 0 : i64, tpu.core_type = #tpu.core_type<tc>, window_params = [{transform_indices = @transform_0, window_bounds = array<i64: 2, 8, 32>}, {pipeline_mode = #tpu.pipeline_mode<synchronous>, transform_indices = @transform_1, window_bounds = array<i64: 32, 96>}, {pipeline_mode = #tpu.pipeline_mode<synchronous>, transform_indices = @transform_2, window_bounds = array<i64: 1, 96>}, {pipeline_mode = #tpu.pipeline_mode<synchronous>, transform_indices = @transform_3, window_bounds = array<i64: 32, 32>}, {pipeline_mode = #tpu.pipeline_mode<synchronous>, transform_indices = @transform_4, window_bounds = array<i64: 1, 32>}, {pipeline_mode = #tpu.pipeline_mode<synchronous>, transform_indices = @transform_5, window_bounds = array<i64: 1, 32>}, {pipeline_mode = #tpu.pipeline_mode<synchronous>, transform_indices = @transform_6, window_bounds = array<i64: 1, 32>}, {pipeline_mode = #tpu.pipeline_mode<synchronous>, transform_indices = @transform_7, window_bounds = array<i64: 96, 32>}, {pipeline_mode = #tpu.pipeline_mode<synchronous>, transform_indices = @transform_8, window_bounds = array<i64: 1, 32>}, {pipeline_mode = #tpu.pipeline_mode<synchronous>, transform_indices = @transform_9, window_bounds = array<i64: 1, 32>}, {pipeline_mode = #tpu.pipeline_mode<synchronous>, transform_indices = @transform_10, window_bounds = array<i64: 1, 32>}, {transform_indices = @transform_11, window_bounds = array<i64: 2, 8, 32>}]} {
    %c0 = arith.constant 0 : index
    %c0_0 = arith.constant 0 : index
    %c0_1 = arith.constant 0 : index
    %0 = vector.load %arg1[%c0, %c0_0, %c0_1] : memref<2x8x32xf32, #tpu.memory_space<vmem>>, vector<2x8x32xf32>
    %1 = vector.shape_cast %0 : vector<2x8x32xf32> to vector<16x32xf32>
    %c0_2 = arith.constant 0 : index
    %c0_3 = arith.constant 0 : index
    %2 = vector.load %arg2[%c0_2, %c0_3] : memref<32x96xf32, #tpu.memory_space<vmem>>, vector<32x96xf32>
    %cst = arith.constant dense<0.000000e+00> : vector<16x96xf32>
    %3 = tpu.matmul %1, %2, %cst {dimension_numbers = #tpu.dot_dimension_numbers<[1], [0], [0], [1], [0, 0, 1, 1], [], []>} : vector<16x32xf32>, vector<32x96xf32>, vector<16x96xf32> -> vector<16x96xf32>
    %c0_4 = arith.constant 0 : index
    %c0_5 = arith.constant 0 : index
    %4 = vector.load %arg3[%c0_4, %c0_5] : memref<1x96xf32, #tpu.memory_space<vmem>>, vector<1x96xf32>
    %5 = vector.broadcast %4 : vector<1x96xf32> to vector<16x96xf32>
    %6 = arith.addf %3, %5 : vector<16x96xf32>
    %7 = tpu.iota {dimensions = array<i32: 1>} : vector<8x32xi32>
    %c0_i32 = arith.constant 0 : i32
    %8 = vector.broadcast %c0_i32 : i32 to vector<8x32xi32>
    %9 = arith.cmpi sge, %7, %8 : vector<8x32xi32>
    %c8_i32 = arith.constant 8 : i32
    %10 = vector.broadcast %c8_i32 : i32 to vector<8x32xi32>
    %11 = arith.cmpi slt, %7, %10 : vector<8x32xi32>
    %12 = arith.andi %9, %11 : vector<8x32xi1>
    %c8_i32_6 = arith.constant 8 : i32
    %13 = vector.broadcast %c8_i32_6 : i32 to vector<8x32xi32>
    %14 = arith.cmpi sge, %7, %13 : vector<8x32xi32>
    %c16_i32 = arith.constant 16 : i32
    %15 = vector.broadcast %c16_i32 : i32 to vector<8x32xi32>
    %16 = arith.cmpi slt, %7, %15 : vector<8x32xi32>
    %17 = arith.andi %14, %16 : vector<8x32xi1>
    %c16_i32_7 = arith.constant 16 : i32
    %18 = vector.broadcast %c16_i32_7 : i32 to vector<8x32xi32>
    %19 = arith.cmpi sge, %7, %18 : vector<8x32xi32>
    %c24_i32 = arith.constant 24 : i32
    %20 = vector.broadcast %c24_i32 : i32 to vector<8x32xi32>
    %21 = arith.cmpi slt, %7, %20 : vector<8x32xi32>
    %22 = arith.andi %19, %21 : vector<8x32xi1>
    %c24_i32_8 = arith.constant 24 : i32
    %23 = vector.broadcast %c24_i32_8 : i32 to vector<8x32xi32>
    %24 = arith.cmpi sge, %7, %23 : vector<8x32xi32>
    %c32_i32 = arith.constant 32 : i32
    %25 = vector.broadcast %c32_i32 : i32 to vector<8x32xi32>
    %26 = arith.cmpi slt, %7, %25 : vector<8x32xi32>
    %27 = arith.andi %24, %26 : vector<8x32xi1>
    %28 = vector.extract_strided_slice %6 {offsets = [0, 0], sizes = [8, 32], strides = [1, 1]} : vector<16x96xf32> to vector<8x32xf32>
    %29 = vector.extract_strided_slice %6 {offsets = [0, 32], sizes = [8, 32], strides = [1, 1]} : vector<16x96xf32> to vector<8x32xf32>
    %30 = vector.extract_strided_slice %6 {offsets = [0, 64], sizes = [8, 32], strides = [1, 1]} : vector<16x96xf32> to vector<8x32xf32>
    %31 = vector.extract_strided_slice %28 {offsets = [0, 0], sizes = [8, 8], strides = [1, 1]} : vector<8x32xf32> to vector<8x8xf32>
    %32 = vector.extract_strided_slice %29 {offsets = [0, 0], sizes = [8, 8], strides = [1, 1]} : vector<8x32xf32> to vector<8x8xf32>
    %cst_9 = arith.constant dense<0.000000e+00> : vector<8x8xf32>
    %33 = tpu.matmul %31, %32, %cst_9 {dimension_numbers = #tpu.dot_dimension_numbers<[1], [1], [0], [0], [0, 0, 1, 0], [], []>} : vector<8x8xf32>, vector<8x8xf32>, vector<8x8xf32> -> vector<8x8xf32>
    %cst_10 = arith.constant dense<0xFF800000> : vector<8xf32>
    %34 = vector.multi_reduction <maximumf>, %33, %cst_10 [1] : vector<8x8xf32> to vector<8xf32>
    %35 = vector.shape_cast %34 : vector<8xf32> to vector<8x1xf32>
    %36 = vector.broadcast %35 : vector<8x1xf32> to vector<8x8xf32>
    %37 = arith.subf %33, %36 : vector<8x8xf32>
    %38 = math.exp %37 : vector<8x8xf32>
    %cst_11 = arith.constant dense<0.000000e+00> : vector<8xf32>
    %39 = vector.multi_reduction <add>, %38, %cst_11 [1] : vector<8x8xf32> to vector<8xf32>
    %40 = vector.shape_cast %39 : vector<8xf32> to vector<8x1xf32>
    %41 = vector.broadcast %40 : vector<8x1xf32> to vector<8x8xf32>
    %42 = arith.divf %38, %41 : vector<8x8xf32>
    %43 = vector.extract_strided_slice %28 {offsets = [0, 8], sizes = [8, 8], strides = [1, 1]} : vector<8x32xf32> to vector<8x8xf32>
    %44 = vector.extract_strided_slice %29 {offsets = [0, 8], sizes = [8, 8], strides = [1, 1]} : vector<8x32xf32> to vector<8x8xf32>
    %cst_12 = arith.constant dense<0.000000e+00> : vector<8x8xf32>
    %45 = tpu.matmul %43, %44, %cst_12 {dimension_numbers = #tpu.dot_dimension_numbers<[1], [1], [0], [0], [0, 0, 1, 0], [], []>} : vector<8x8xf32>, vector<8x8xf32>, vector<8x8xf32> -> vector<8x8xf32>
    %cst_13 = arith.constant dense<0xFF800000> : vector<8xf32>
    %46 = vector.multi_reduction <maximumf>, %45, %cst_13 [1] : vector<8x8xf32> to vector<8xf32>
    %47 = vector.shape_cast %46 : vector<8xf32> to vector<8x1xf32>
    %48 = vector.broadcast %47 : vector<8x1xf32> to vector<8x8xf32>
    %49 = arith.subf %45, %48 : vector<8x8xf32>
    %50 = math.exp %49 : vector<8x8xf32>
    %cst_14 = arith.constant dense<0.000000e+00> : vector<8xf32>
    %51 = vector.multi_reduction <add>, %50, %cst_14 [1] : vector<8x8xf32> to vector<8xf32>
    %52 = vector.shape_cast %51 : vector<8xf32> to vector<8x1xf32>
    %53 = vector.broadcast %52 : vector<8x1xf32> to vector<8x8xf32>
    %54 = arith.divf %50, %53 : vector<8x8xf32>
    %55 = vector.extract_strided_slice %28 {offsets = [0, 16], sizes = [8, 8], strides = [1, 1]} : vector<8x32xf32> to vector<8x8xf32>
    %56 = vector.extract_strided_slice %29 {offsets = [0, 16], sizes = [8, 8], strides = [1, 1]} : vector<8x32xf32> to vector<8x8xf32>
    %cst_15 = arith.constant dense<0.000000e+00> : vector<8x8xf32>
    %57 = tpu.matmul %55, %56, %cst_15 {dimension_numbers = #tpu.dot_dimension_numbers<[1], [1], [0], [0], [0, 0, 1, 0], [], []>} : vector<8x8xf32>, vector<8x8xf32>, vector<8x8xf32> -> vector<8x8xf32>
    %cst_16 = arith.constant dense<0xFF800000> : vector<8xf32>
    %58 = vector.multi_reduction <maximumf>, %57, %cst_16 [1] : vector<8x8xf32> to vector<8xf32>
    %59 = vector.shape_cast %58 : vector<8xf32> to vector<8x1xf32>
    %60 = vector.broadcast %59 : vector<8x1xf32> to vector<8x8xf32>
    %61 = arith.subf %57, %60 : vector<8x8xf32>
    %62 = math.exp %61 : vector<8x8xf32>
    %cst_17 = arith.constant dense<0.000000e+00> : vector<8xf32>
    %63 = vector.multi_reduction <add>, %62, %cst_17 [1] : vector<8x8xf32> to vector<8xf32>
    %64 = vector.shape_cast %63 : vector<8xf32> to vector<8x1xf32>
    %65 = vector.broadcast %64 : vector<8x1xf32> to vector<8x8xf32>
    %66 = arith.divf %62, %65 : vector<8x8xf32>
    %67 = vector.extract_strided_slice %28 {offsets = [0, 24], sizes = [8, 8], strides = [1, 1]} : vector<8x32xf32> to vector<8x8xf32>
    %68 = vector.extract_strided_slice %29 {offsets = [0, 24], sizes = [8, 8], strides = [1, 1]} : vector<8x32xf32> to vector<8x8xf32>
    %cst_18 = arith.constant dense<0.000000e+00> : vector<8x8xf32>
    %69 = tpu.matmul %67, %68, %cst_18 {dimension_numbers = #tpu.dot_dimension_numbers<[1], [1], [0], [0], [0, 0, 1, 0], [], []>} : vector<8x8xf32>, vector<8x8xf32>, vector<8x8xf32> -> vector<8x8xf32>
    %cst_19 = arith.constant dense<0xFF800000> : vector<8xf32>
    %70 = vector.multi_reduction <maximumf>, %69, %cst_19 [1] : vector<8x8xf32> to vector<8xf32>
    %71 = vector.shape_cast %70 : vector<8xf32> to vector<8x1xf32>
    %72 = vector.broadcast %71 : vector<8x1xf32> to vector<8x8xf32>
    %73 = arith.subf %69, %72 : vector<8x8xf32>
    %74 = math.exp %73 : vector<8x8xf32>
    %cst_20 = arith.constant dense<0.000000e+00> : vector<8xf32>
    %75 = vector.multi_reduction <add>, %74, %cst_20 [1] : vector<8x8xf32> to vector<8xf32>
    %76 = vector.shape_cast %75 : vector<8xf32> to vector<8x1xf32>
    %77 = vector.broadcast %76 : vector<8x1xf32> to vector<8x8xf32>
    %78 = arith.divf %74, %77 : vector<8x8xf32>
    %79 = tpu.concatenate %42, %54, %66, %78 in 1 : vector<8x8xf32>, vector<8x8xf32>, vector<8x8xf32>, vector<8x8xf32> -> vector<8x32xf32>
    %cst_21 = arith.constant 0.000000e+00 : f32
    %80 = vector.broadcast %cst_21 : f32 to vector<8x32xf32>
    %81 = arith.select %12, %30, %80 : vector<8x32xi1>, vector<8x32xf32>
    %cst_22 = arith.constant 0.000000e+00 : f32
    %82 = vector.broadcast %cst_22 : f32 to vector<8x32xf32>
    %83 = arith.select %17, %30, %82 : vector<8x32xi1>, vector<8x32xf32>
    %cst_23 = arith.constant 0.000000e+00 : f32
    %84 = vector.broadcast %cst_23 : f32 to vector<8x32xf32>
    %85 = arith.select %22, %30, %84 : vector<8x32xi1>, vector<8x32xf32>
    %cst_24 = arith.constant 0.000000e+00 : f32
    %86 = vector.broadcast %cst_24 : f32 to vector<8x32xf32>
    %87 = arith.select %27, %30, %86 : vector<8x32xi1>, vector<8x32xf32>
    %88 = tpu.concatenate %81, %83, %85, %87 in 0 : vector<8x32xf32>, vector<8x32xf32>, vector<8x32xf32>, vector<8x32xf32> -> vector<32x32xf32>
    %cst_25 = arith.constant dense<0.000000e+00> : vector<8x32xf32>
    %89 = tpu.matmul %79, %88, %cst_25 {dimension_numbers = #tpu.dot_dimension_numbers<[1], [0], [0], [1], [0, 0, 1, 1], [], []>} : vector<8x32xf32>, vector<32x32xf32>, vector<8x32xf32> -> vector<8x32xf32>
    %90 = vector.extract_strided_slice %6 {offsets = [8, 0], sizes = [8, 32], strides = [1, 1]} : vector<16x96xf32> to vector<8x32xf32>
    %91 = vector.extract_strided_slice %6 {offsets = [8, 32], sizes = [8, 32], strides = [1, 1]} : vector<16x96xf32> to vector<8x32xf32>
    %92 = vector.extract_strided_slice %6 {offsets = [8, 64], sizes = [8, 32], strides = [1, 1]} : vector<16x96xf32> to vector<8x32xf32>
    %93 = vector.extract_strided_slice %90 {offsets = [0, 0], sizes = [8, 8], strides = [1, 1]} : vector<8x32xf32> to vector<8x8xf32>
    %94 = vector.extract_strided_slice %91 {offsets = [0, 0], sizes = [8, 8], strides = [1, 1]} : vector<8x32xf32> to vector<8x8xf32>
    %cst_26 = arith.constant dense<0.000000e+00> : vector<8x8xf32>
    %95 = tpu.matmul %93, %94, %cst_26 {dimension_numbers = #tpu.dot_dimension_numbers<[1], [1], [0], [0], [0, 0, 1, 0], [], []>} : vector<8x8xf32>, vector<8x8xf32>, vector<8x8xf32> -> vector<8x8xf32>
    %cst_27 = arith.constant dense<0xFF800000> : vector<8xf32>
    %96 = vector.multi_reduction <maximumf>, %95, %cst_27 [1] : vector<8x8xf32> to vector<8xf32>
    %97 = vector.shape_cast %96 : vector<8xf32> to vector<8x1xf32>
    %98 = vector.broadcast %97 : vector<8x1xf32> to vector<8x8xf32>
    %99 = arith.subf %95, %98 : vector<8x8xf32>
    %100 = math.exp %99 : vector<8x8xf32>
    %cst_28 = arith.constant dense<0.000000e+00> : vector<8xf32>
    %101 = vector.multi_reduction <add>, %100, %cst_28 [1] : vector<8x8xf32> to vector<8xf32>
    %102 = vector.shape_cast %101 : vector<8xf32> to vector<8x1xf32>
    %103 = vector.broadcast %102 : vector<8x1xf32> to vector<8x8xf32>
    %104 = arith.divf %100, %103 : vector<8x8xf32>
    %105 = vector.extract_strided_slice %90 {offsets = [0, 8], sizes = [8, 8], strides = [1, 1]} : vector<8x32xf32> to vector<8x8xf32>
    %106 = vector.extract_strided_slice %91 {offsets = [0, 8], sizes = [8, 8], strides = [1, 1]} : vector<8x32xf32> to vector<8x8xf32>
    %cst_29 = arith.constant dense<0.000000e+00> : vector<8x8xf32>
    %107 = tpu.matmul %105, %106, %cst_29 {dimension_numbers = #tpu.dot_dimension_numbers<[1], [1], [0], [0], [0, 0, 1, 0], [], []>} : vector<8x8xf32>, vector<8x8xf32>, vector<8x8xf32> -> vector<8x8xf32>
    %cst_30 = arith.constant dense<0xFF800000> : vector<8xf32>
    %108 = vector.multi_reduction <maximumf>, %107, %cst_30 [1] : vector<8x8xf32> to vector<8xf32>
    %109 = vector.shape_cast %108 : vector<8xf32> to vector<8x1xf32>
    %110 = vector.broadcast %109 : vector<8x1xf32> to vector<8x8xf32>
    %111 = arith.subf %107, %110 : vector<8x8xf32>
    %112 = math.exp %111 : vector<8x8xf32>
    %cst_31 = arith.constant dense<0.000000e+00> : vector<8xf32>
    %113 = vector.multi_reduction <add>, %112, %cst_31 [1] : vector<8x8xf32> to vector<8xf32>
    %114 = vector.shape_cast %113 : vector<8xf32> to vector<8x1xf32>
    %115 = vector.broadcast %114 : vector<8x1xf32> to vector<8x8xf32>
    %116 = arith.divf %112, %115 : vector<8x8xf32>
    %117 = vector.extract_strided_slice %90 {offsets = [0, 16], sizes = [8, 8], strides = [1, 1]} : vector<8x32xf32> to vector<8x8xf32>
    %118 = vector.extract_strided_slice %91 {offsets = [0, 16], sizes = [8, 8], strides = [1, 1]} : vector<8x32xf32> to vector<8x8xf32>
    %cst_32 = arith.constant dense<0.000000e+00> : vector<8x8xf32>
    %119 = tpu.matmul %117, %118, %cst_32 {dimension_numbers = #tpu.dot_dimension_numbers<[1], [1], [0], [0], [0, 0, 1, 0], [], []>} : vector<8x8xf32>, vector<8x8xf32>, vector<8x8xf32> -> vector<8x8xf32>
    %cst_33 = arith.constant dense<0xFF800000> : vector<8xf32>
    %120 = vector.multi_reduction <maximumf>, %119, %cst_33 [1] : vector<8x8xf32> to vector<8xf32>
    %121 = vector.shape_cast %120 : vector<8xf32> to vector<8x1xf32>
    %122 = vector.broadcast %121 : vector<8x1xf32> to vector<8x8xf32>
    %123 = arith.subf %119, %122 : vector<8x8xf32>
    %124 = math.exp %123 : vector<8x8xf32>
    %cst_34 = arith.constant dense<0.000000e+00> : vector<8xf32>
    %125 = vector.multi_reduction <add>, %124, %cst_34 [1] : vector<8x8xf32> to vector<8xf32>
    %126 = vector.shape_cast %125 : vector<8xf32> to vector<8x1xf32>
    %127 = vector.broadcast %126 : vector<8x1xf32> to vector<8x8xf32>
    %128 = arith.divf %124, %127 : vector<8x8xf32>
    %129 = vector.extract_strided_slice %90 {offsets = [0, 24], sizes = [8, 8], strides = [1, 1]} : vector<8x32xf32> to vector<8x8xf32>
    %130 = vector.extract_strided_slice %91 {offsets = [0, 24], sizes = [8, 8], strides = [1, 1]} : vector<8x32xf32> to vector<8x8xf32>
    %cst_35 = arith.constant dense<0.000000e+00> : vector<8x8xf32>
    %131 = tpu.matmul %129, %130, %cst_35 {dimension_numbers = #tpu.dot_dimension_numbers<[1], [1], [0], [0], [0, 0, 1, 0], [], []>} : vector<8x8xf32>, vector<8x8xf32>, vector<8x8xf32> -> vector<8x8xf32>
    %cst_36 = arith.constant dense<0xFF800000> : vector<8xf32>
    %132 = vector.multi_reduction <maximumf>, %131, %cst_36 [1] : vector<8x8xf32> to vector<8xf32>
    %133 = vector.shape_cast %132 : vector<8xf32> to vector<8x1xf32>
    %134 = vector.broadcast %133 : vector<8x1xf32> to vector<8x8xf32>
    %135 = arith.subf %131, %134 : vector<8x8xf32>
    %136 = math.exp %135 : vector<8x8xf32>
    %cst_37 = arith.constant dense<0.000000e+00> : vector<8xf32>
    %137 = vector.multi_reduction <add>, %136, %cst_37 [1] : vector<8x8xf32> to vector<8xf32>
    %138 = vector.shape_cast %137 : vector<8xf32> to vector<8x1xf32>
    %139 = vector.broadcast %138 : vector<8x1xf32> to vector<8x8xf32>
    %140 = arith.divf %136, %139 : vector<8x8xf32>
    %141 = tpu.concatenate %104, %116, %128, %140 in 1 : vector<8x8xf32>, vector<8x8xf32>, vector<8x8xf32>, vector<8x8xf32> -> vector<8x32xf32>
    %cst_38 = arith.constant 0.000000e+00 : f32
    %142 = vector.broadcast %cst_38 : f32 to vector<8x32xf32>
    %143 = arith.select %12, %92, %142 : vector<8x32xi1>, vector<8x32xf32>
    %cst_39 = arith.constant 0.000000e+00 : f32
    %144 = vector.broadcast %cst_39 : f32 to vector<8x32xf32>
    %145 = arith.select %17, %92, %144 : vector<8x32xi1>, vector<8x32xf32>
    %cst_40 = arith.constant 0.000000e+00 : f32
    %146 = vector.broadcast %cst_40 : f32 to vector<8x32xf32>
    %147 = arith.select %22, %92, %146 : vector<8x32xi1>, vector<8x32xf32>
    %cst_41 = arith.constant 0.000000e+00 : f32
    %148 = vector.broadcast %cst_41 : f32 to vector<8x32xf32>
    %149 = arith.select %27, %92, %148 : vector<8x32xi1>, vector<8x32xf32>
    %150 = tpu.concatenate %143, %145, %147, %149 in 0 : vector<8x32xf32>, vector<8x32xf32>, vector<8x32xf32>, vector<8x32xf32> -> vector<32x32xf32>
    %cst_42 = arith.constant dense<0.000000e+00> : vector<8x32xf32>
    %151 = tpu.matmul %141, %150, %cst_42 {dimension_numbers = #tpu.dot_dimension_numbers<[1], [0], [0], [1], [0, 0, 1, 1], [], []>} : vector<8x32xf32>, vector<32x32xf32>, vector<8x32xf32> -> vector<8x32xf32>
    %152 = tpu.concatenate %89, %151 in 0 : vector<8x32xf32>, vector<8x32xf32> -> vector<16x32xf32>
    %c0_43 = arith.constant 0 : index
    %c0_44 = arith.constant 0 : index
    %153 = vector.load %arg4[%c0_43, %c0_44] : memref<32x32xf32, #tpu.memory_space<vmem>>, vector<32x32xf32>
    %cst_45 = arith.constant dense<0.000000e+00> : vector<16x32xf32>
    %154 = tpu.matmul %152, %153, %cst_45 {dimension_numbers = #tpu.dot_dimension_numbers<[1], [0], [0], [1], [0, 0, 1, 1], [], []>} : vector<16x32xf32>, vector<32x32xf32>, vector<16x32xf32> -> vector<16x32xf32>
    %c0_46 = arith.constant 0 : index
    %c0_47 = arith.constant 0 : index
    %155 = vector.load %arg5[%c0_46, %c0_47] : memref<1x32xf32, #tpu.memory_space<vmem>>, vector<1x32xf32>
    %156 = vector.broadcast %155 : vector<1x32xf32> to vector<16x32xf32>
    %157 = arith.addf %154, %156 : vector<16x32xf32>
    %158 = arith.addf %1, %157 : vector<16x32xf32>
    %c0_48 = arith.constant 0 : index
    %c0_49 = arith.constant 0 : index
    %159 = vector.load %arg6[%c0_48, %c0_49] : memref<1x32xf32, #tpu.memory_space<vmem>>, vector<1x32xf32>
    %c0_50 = arith.constant 0 : index
    %c0_51 = arith.constant 0 : index
    %160 = vector.load %arg7[%c0_50, %c0_51] : memref<1x32xf32, #tpu.memory_space<vmem>>, vector<1x32xf32>
    %cst_52 = arith.constant dense<0.000000e+00> : vector<16xf32>
    %161 = vector.multi_reduction <add>, %158, %cst_52 [1] : vector<16x32xf32> to vector<16xf32>
    %162 = vector.shape_cast %161 : vector<16xf32> to vector<16x1xf32>
    %cst_53 = arith.constant 3.200000e+01 : f32
    %163 = vector.broadcast %cst_53 : f32 to vector<16x1xf32>
    %164 = arith.divf %162, %163 : vector<16x1xf32>
    %165 = vector.broadcast %164 : vector<16x1xf32> to vector<16x32xf32>
    %166 = arith.subf %158, %165 : vector<16x32xf32>
    %167 = arith.mulf %166, %166 : vector<16x32xf32>
    %cst_54 = arith.constant dense<0.000000e+00> : vector<16xf32>
    %168 = vector.multi_reduction <add>, %167, %cst_54 [1] : vector<16x32xf32> to vector<16xf32>
    %169 = vector.shape_cast %168 : vector<16xf32> to vector<16x1xf32>
    %cst_55 = arith.constant 3.200000e+01 : f32
    %170 = vector.broadcast %cst_55 : f32 to vector<16x1xf32>
    %171 = arith.divf %169, %170 : vector<16x1xf32>
    %172 = vector.broadcast %164 : vector<16x1xf32> to vector<16x32xf32>
    %173 = arith.subf %158, %172 : vector<16x32xf32>
    %cst_56 = arith.constant 9.99999974E-6 : f32
    %174 = vector.broadcast %cst_56 : f32 to vector<16x1xf32>
    %175 = arith.addf %171, %174 : vector<16x1xf32>
    %176 = math.rsqrt %175 : vector<16x1xf32>
    %177 = vector.broadcast %176 : vector<16x1xf32> to vector<16x32xf32>
    %178 = arith.mulf %173, %177 : vector<16x32xf32>
    %179 = vector.broadcast %159 : vector<1x32xf32> to vector<16x32xf32>
    %180 = arith.mulf %178, %179 : vector<16x32xf32>
    %181 = vector.broadcast %160 : vector<1x32xf32> to vector<16x32xf32>
    %182 = arith.addf %180, %181 : vector<16x32xf32>
    %183 = tpu.iota {dimensions = array<i32: 0>} : vector<16x32xi32>
    %c8_i32_57 = arith.constant 8 : i32
    %c0_i32_58 = arith.constant 0 : i32
    %184 = arith.cmpi eq, %c8_i32_57, %c0_i32_58 : i32
    %c1_i32 = arith.constant 1 : i32
    %185 = arith.select %184, %c1_i32, %c8_i32_57 : i32
    %186 = vector.broadcast %185 : i32 to vector<16x32xi32>
    %187 = arith.remsi %183, %186 : vector<16x32xi32>
    %c0_i32_59 = arith.constant 0 : i32
    %188 = vector.broadcast %c0_i32_59 : i32 to vector<16x32xi32>
    %189 = arith.cmpi ne, %187, %188 : vector<16x32xi32>
    %c0_i32_60 = arith.constant 0 : i32
    %190 = vector.broadcast %c0_i32_60 : i32 to vector<16x32xi32>
    %191 = arith.cmpi slt, %187, %190 : vector<16x32xi32>
    %c0_i32_61 = arith.constant 0 : i32
    %192 = arith.cmpi slt, %185, %c0_i32_61 : i32
    %193 = vector.broadcast %192 : i1 to vector<16x32xi1>
    %194 = vector.broadcast %193 : vector<16x32xi1> to vector<16x32xi1>
    %195 = arith.xori %191, %194 : vector<16x32xi1>
    %196 = arith.andi %195, %189 : vector<16x32xi1>
    %197 = vector.broadcast %185 : i32 to vector<16x32xi32>
    %198 = arith.addi %187, %197 : vector<16x32xi32>
    %199 = arith.select %196, %198, %187 : vector<16x32xi1>, vector<16x32xi32>
    %c1_i32_62 = arith.constant 1 : i32
    %200 = vector.broadcast %c1_i32_62 : i32 to vector<16x32xi32>
    %201 = arith.cmpi sge, %199, %200 : vector<16x32xi32>
    %c1_i32_63 = arith.constant 1 : i32
    %202 = tpu.dynamic_rotate %182 by %c1_i32_63 dim 0 : vector<16x32xf32>, i32 -> vector<16x32xf32>
    %cst_64 = arith.constant 0.000000e+00 : f32
    %203 = vector.broadcast %cst_64 : f32 to vector<16x32xf32>
    %204 = arith.select %201, %202, %203 : vector<16x32xi1>, vector<16x32xf32>
    %c6_i32 = arith.constant 6 : i32
    %205 = vector.broadcast %c6_i32 : i32 to vector<16x32xi32>
    %206 = arith.cmpi sle, %199, %205 : vector<16x32xi32>
    %c15_i32 = arith.constant 15 : i32
    %207 = tpu.dynamic_rotate %182 by %c15_i32 dim 0 : vector<16x32xf32>, i32 -> vector<16x32xf32>
    %cst_65 = arith.constant 0.000000e+00 : f32
    %208 = vector.broadcast %cst_65 : f32 to vector<16x32xf32>
    %209 = arith.select %206, %207, %208 : vector<16x32xi1>, vector<16x32xf32>
    %210 = tpu.concatenate %204, %182, %209 in 1 : vector<16x32xf32>, vector<16x32xf32>, vector<16x32xf32> -> vector<16x96xf32>
    %c0_66 = arith.constant 0 : index
    %c0_67 = arith.constant 0 : index
    %211 = vector.load %arg8[%c0_66, %c0_67] : memref<96x32xf32, #tpu.memory_space<vmem>>, vector<96x32xf32>
    %cst_68 = arith.constant dense<0.000000e+00> : vector<16x32xf32>
    %212 = tpu.matmul %210, %211, %cst_68 {dimension_numbers = #tpu.dot_dimension_numbers<[1], [0], [0], [1], [0, 0, 1, 1], [], []>} : vector<16x96xf32>, vector<96x32xf32>, vector<16x32xf32> -> vector<16x32xf32>
    %c0_69 = arith.constant 0 : index
    %c0_70 = arith.constant 0 : index
    %213 = vector.load %arg9[%c0_69, %c0_70] : memref<1x32xf32, #tpu.memory_space<vmem>>, vector<1x32xf32>
    %214 = vector.broadcast %213 : vector<1x32xf32> to vector<16x32xf32>
    %215 = arith.addf %212, %214 : vector<16x32xf32>
    %cst_71 = arith.constant 0.000000e+00 : f32
    %216 = vector.broadcast %cst_71 : f32 to vector<16x32xf32>
    %217 = arith.maximumf %215, %216 : vector<16x32xf32>
    %218 = arith.addf %182, %217 : vector<16x32xf32>
    %c0_72 = arith.constant 0 : index
    %c0_73 = arith.constant 0 : index
    %219 = vector.load %arg10[%c0_72, %c0_73] : memref<1x32xf32, #tpu.memory_space<vmem>>, vector<1x32xf32>
    %c0_74 = arith.constant 0 : index
    %c0_75 = arith.constant 0 : index
    %220 = vector.load %arg11[%c0_74, %c0_75] : memref<1x32xf32, #tpu.memory_space<vmem>>, vector<1x32xf32>
    %cst_76 = arith.constant dense<0.000000e+00> : vector<16xf32>
    %221 = vector.multi_reduction <add>, %218, %cst_76 [1] : vector<16x32xf32> to vector<16xf32>
    %222 = vector.shape_cast %221 : vector<16xf32> to vector<16x1xf32>
    %cst_77 = arith.constant 3.200000e+01 : f32
    %223 = vector.broadcast %cst_77 : f32 to vector<16x1xf32>
    %224 = arith.divf %222, %223 : vector<16x1xf32>
    %225 = vector.broadcast %224 : vector<16x1xf32> to vector<16x32xf32>
    %226 = arith.subf %218, %225 : vector<16x32xf32>
    %227 = arith.mulf %226, %226 : vector<16x32xf32>
    %cst_78 = arith.constant dense<0.000000e+00> : vector<16xf32>
    %228 = vector.multi_reduction <add>, %227, %cst_78 [1] : vector<16x32xf32> to vector<16xf32>
    %229 = vector.shape_cast %228 : vector<16xf32> to vector<16x1xf32>
    %cst_79 = arith.constant 3.200000e+01 : f32
    %230 = vector.broadcast %cst_79 : f32 to vector<16x1xf32>
    %231 = arith.divf %229, %230 : vector<16x1xf32>
    %232 = vector.broadcast %224 : vector<16x1xf32> to vector<16x32xf32>
    %233 = arith.subf %218, %232 : vector<16x32xf32>
    %cst_80 = arith.constant 9.99999974E-6 : f32
    %234 = vector.broadcast %cst_80 : f32 to vector<16x1xf32>
    %235 = arith.addf %231, %234 : vector<16x1xf32>
    %236 = math.rsqrt %235 : vector<16x1xf32>
    %237 = vector.broadcast %236 : vector<16x1xf32> to vector<16x32xf32>
    %238 = arith.mulf %233, %237 : vector<16x32xf32>
    %239 = vector.broadcast %219 : vector<1x32xf32> to vector<16x32xf32>
    %240 = arith.mulf %238, %239 : vector<16x32xf32>
    %241 = vector.broadcast %220 : vector<1x32xf32> to vector<16x32xf32>
    %242 = arith.addf %240, %241 : vector<16x32xf32>
    %243 = vector.shape_cast %242 : vector<16x32xf32> to vector<2x8x32xf32>
    %c0_81 = arith.constant 0 : index
    %c0_82 = arith.constant 0 : index
    %c0_83 = arith.constant 0 : index
    %244 = vector.load %arg12[%c0_81, %c0_82, %c0_83] : memref<2x8x32xf32, #tpu.memory_space<vmem>>, vector<2x8x32xf32>
    tpu.vector_store %arg12[%c0_81, %c0_82, %c0_83], %243 {strides = array<i32>} : memref<2x8x32xf32, #tpu.memory_space<vmem>>, vector<2x8x32xf32>,
    return
  }
  func.func @transform_0(%arg0: i32) -> (i32, i32, i32) {
    %c0_i32 = arith.constant 0 : i32
    %c0_i32_0 = arith.constant 0 : i32
    %c0_i32_1 = arith.constant 0 : i32
    return %arg0, %c0_i32, %c0_i32_0 : i32, i32, i32
  }
  func.func @transform_1(%arg0: i32) -> (i32, i32) {
    %c0_i32 = arith.constant 0 : i32
    %c0_i32_0 = arith.constant 0 : i32
    %c0_i32_1 = arith.constant 0 : i32
    return %c0_i32, %c0_i32_0 : i32, i32
  }
  func.func @transform_2(%arg0: i32) -> (i32, i32) {
    %c0_i32 = arith.constant 0 : i32
    %c0_i32_0 = arith.constant 0 : i32
    %c0_i32_1 = arith.constant 0 : i32
    return %c0_i32, %c0_i32_0 : i32, i32
  }
  func.func @transform_3(%arg0: i32) -> (i32, i32) {
    %c0_i32 = arith.constant 0 : i32
    %c0_i32_0 = arith.constant 0 : i32
    %c0_i32_1 = arith.constant 0 : i32
    return %c0_i32, %c0_i32_0 : i32, i32
  }
  func.func @transform_4(%arg0: i32) -> (i32, i32) {
    %c0_i32 = arith.constant 0 : i32
    %c0_i32_0 = arith.constant 0 : i32
    %c0_i32_1 = arith.constant 0 : i32
    return %c0_i32, %c0_i32_0 : i32, i32
  }
  func.func @transform_5(%arg0: i32) -> (i32, i32) {
    %c0_i32 = arith.constant 0 : i32
    %c0_i32_0 = arith.constant 0 : i32
    %c0_i32_1 = arith.constant 0 : i32
    return %c0_i32, %c0_i32_0 : i32, i32
  }
  func.func @transform_6(%arg0: i32) -> (i32, i32) {
    %c0_i32 = arith.constant 0 : i32
    %c0_i32_0 = arith.constant 0 : i32
    %c0_i32_1 = arith.constant 0 : i32
    return %c0_i32, %c0_i32_0 : i32, i32
  }
  func.func @transform_7(%arg0: i32) -> (i32, i32) {
    %c0_i32 = arith.constant 0 : i32
    %c0_i32_0 = arith.constant 0 : i32
    %c0_i32_1 = arith.constant 0 : i32
    return %c0_i32, %c0_i32_0 : i32, i32
  }
  func.func @transform_8(%arg0: i32) -> (i32, i32) {
    %c0_i32 = arith.constant 0 : i32
    %c0_i32_0 = arith.constant 0 : i32
    %c0_i32_1 = arith.constant 0 : i32
    return %c0_i32, %c0_i32_0 : i32, i32
  }
  func.func @transform_9(%arg0: i32) -> (i32, i32) {
    %c0_i32 = arith.constant 0 : i32
    %c0_i32_0 = arith.constant 0 : i32
    %c0_i32_1 = arith.constant 0 : i32
    return %c0_i32, %c0_i32_0 : i32, i32
  }
  func.func @transform_10(%arg0: i32) -> (i32, i32) {
    %c0_i32 = arith.constant 0 : i32
    %c0_i32_0 = arith.constant 0 : i32
    %c0_i32_1 = arith.constant 0 : i32
    return %c0_i32, %c0_i32_0 : i32, i32
  }
  func.func @transform_11(%arg0: i32) -> (i32, i32, i32) {
    %c0_i32 = arith.constant 0 : i32
    %c0_i32_0 = arith.constant 0 : i32
    %c0_i32_1 = arith.constant 0 : i32
    return %arg0, %c0_i32, %c0_i32_0 : i32, i32, i32
  }
}

</mosaic_0001>

<bundles_post_ra>
// kernel: tpu_custom_call.1
= control target key start
LH: loop header
LB: loop body
LE: loop exit
PB: predicated region body
PF: predicated region fallthrough
CT: control target
= control target key end

     0   :  { %vm52_vm0 = vcmask 261120   ;;  %s2073_s0 = inlined_call_operand.vmem [shape: f32[2,8,32], index: 0, kind: input, shape index: {}]   ;;  %s2074_s1 = inlined_call_operand.vmem [shape: f32[32,96], index: 1, kind: input, shape index: {}]   ;;  %s2075_s2 = inlined_call_operand.vmem [shape: f32[1,96], index: 2, kind: input, shape index: {}]   ;;  %s2076_s3 = inlined_call_operand.vmem [shape: f32[32,32], index: 3, kind: input, shape index: {}]   ;;  %s2077_s4 = inlined_call_operand.vmem [shape: f32[1,32], index: 4, kind: input, shape index: {}]   ;;  %s2078_s5 = inlined_call_operand.vmem [shape: f32[1,32], index: 5, kind: input, shape index: {}]   ;;  %s2079_s6 = inlined_call_operand.vmem [shape: f32[1,32], index: 6, kind: input, shape index: {}]   ;;  %s2080_s7 = inlined_call_operand.vmem [shape: f32[96,32], index: 7, kind: input, shape index: {}]   ;;  %s2081_s8 = inlined_call_operand.vmem [shape: f32[1,32], index: 8, kind: input, shape index: {}]   ;;  %s2082_s9 = inlined_call_operand.vmem [shape: f32[1,32], index: 9, kind: input, shape index: {}]   ;;  %s2083_s10 = inlined_call_operand.vmem [shape: f32[1,32], index: 10, kind: input, shape index: {}]   ;;  %s2084_s11 = inlined_call_operand.hbm [shape: f32[2,8,32], index: 11, kind: output, shape index: {}]  }
   0x1   :  { %v44_v0 = vld [vmem:[%s2074_s1 + $0x18] sm:$0xff]  ;;  %v43_v1 = vld [vmem:[%s2074_s1 + $0x10] sm:$0xff]  ;;  %v1788_v2 = vld [vmem:[%s2073_s0] sm:$0xff] }
   0x2   :  { %1514 = vmatprep.subr.mxu1 %v44_v0  ;;  %v42_v3 = vld [vmem:[%s2074_s1 + $0x8] sm:$0xff]  ;;  %1522 = vmatprep.mubr.msk.f32.mxu1 %vm52_vm0, %v1788_v2 }
   0x3   :  { %1515 = vmatpush3.msra.mxu1 %v44_v0 }
   0x4   :  { %16 = vsyncpa [#allocation3], 0  ;;  %1516 = vmatprep.subr.mxu1 %v43_v1  ;;  %v41_v4 = vld [vmem:[%s2074_s1] sm:$0xff]  ;;  %v1801_v5 = vld [vmem:[%s2073_s0 + $0x8] sm:$0xff]  ;;  %v1703_v6 = vmov 0.0   ;;  %vm1704_vm1 = vmmov 0   ;;  %v134_v51 = vlaneseq }
   0x5   :  { %1517 = vmatpush3.msra.mxu1 %v43_v1  ;;  %1545 = vmatprep.subr.mxu0 %v1703_v6  ;;  %v1423_v7 = vld [vmem:[%s2075_s2] ss:$0 sm:$0xff]  ;;  %s1705_s29 = smov 120   ;;  %s1706_s30 = smov 96   ;;  %vm151_vm2 = vcmask 64512   ;;  %vm517_vm13 = vcmask 130048  }
   0x6   :  { %1518 = vmatprep.subr.mxu1 %v42_v3  ;;  %1553 = vmatprep.mubr.msk.f32.mxu0 %vm1704_vm1, %v1703_v6  ;;  %s1707_s12 = smov 80   ;;  %s1708_s13 = smov 88   ;;  %v1873_v53 = vand.u32 127, %v134_v51  ;;  %vm519_vm14 = vcmask 195584   ;;  %v1053_v57 = vld [vmem:[%s2076_s3 + $0x10] sm:$0xff]  ;;  %v1052_v59 = vld [vmem:[%s2076_s3 + $0x8] sm:$0xff] }
   0x7   :  { %1519 = vmatpush3.msra.mxu1 %v42_v3  ;;  %s1709_s2 = smov 72   ;;  %s1710_s14 = smov 112  }
   0x8   :  { %1520 = vmatprep.subr.mxu1 %v41_v4  ;;  %s1711_s15 = smov 104   ;;  %s1712_s16 = smov 64   ;;  %vm145_vm3 = vcmp.ge.s32.totalorder %v1873_v53, 24  ;;  %vm146_vm4 = vcmp.lt.s32.totalorder %v1873_v53, 32  ;;  %vm142_vm5 = vcmp.ge.s32.totalorder %v1873_v53, 16  ;;  %vm143_vm6 = vcmp.lt.s32.totalorder %v1873_v53, 24 }
   0x9   :  { %1521 = vmatpush3.msra.mxu1 %v41_v4  ;;  %vm1879_vm7 = vmand %vm145_vm3, %vm146_vm4  ;;  %vm139_vm9 = vcmp.ge.s32.totalorder %v1873_v53, 8  ;;  %vm140_vm10 = vcmp.lt.s32.totalorder %v1873_v53, 16  ;;  %s1713_s17 = smov 8   ;;  %vm137_vm12 = vcmp.lt.s32.totalorder %v1873_v53, 8  ;;  %s1714_s18 = smov 16  }
   0xa   :  { %1523 = vmatmul.mubr.msk.f32.vlgmr.msra.gmra.mxu1 %vm52_vm0, %v1801_v5  ;;  %1525 = vmatprep.subr.mxu1 %v1703_v6  ;;  %vm1883_vm8 = vmand %vm142_vm5, %vm143_vm6  ;;  %s1715_s19 = smov 24   ;;  %vm1253_vm6 = vcmask 523264  }
   0xb   :  { %1527 = vmatprep.mubr.msk.f32.mxu1 %vm1704_vm1, %v1703_v6  ;;  %vm1896_vm11 = vmand %vm139_vm9, %vm140_vm10 }
  0xca   :  { %v1524_v8 = vpop.f32.mrf.mxu1 }
  0xcb   :  { %v1814_v9 = vadd.f32 %v1524_v8, %v1423_v7 }
  0xcc   :  { %v125_v10 = vpop.f32.mrf.mxu1 }
  0xcd   :  { %v1816_v11 = vadd.f32 %v1423_v7, %v125_v10 }
  0xcf   :  { %237 = vrot.lane.b32.xlu1 %v1816_v11, %s1705_s29  ;;  %149 = vrot.lane.b32.xlu0 %v1816_v11, %s1706_s30 }
  0xd3   :  { %328 = vrot.lane.b32.xlu1 %v1816_v11, %s1707_s12  ;;  %239 = vrot.lane.b32.xlu0 %v1816_v11, %s1708_s13 }
  0xd7   :  { %417 = vrot.lane.b32.xlu1 %v1816_v11, %s1709_s2  ;;  %326 = vrot.lane.b32.xlu0 %v1816_v11, %s1710_s14 }
  0xdb   :  { %415 = vrot.lane.b32.xlu0 %v1816_v11, %s1711_s15 }
 0x141   :  { %v238_v12 = vpop.permute.xlu1 %237  ;;  %v150_v13 = vpop.permute.xlu0 %149 }
 0x142   :  { %1526 = vmatpush3.xpose.msk.msra.mxu1 %vm151_vm2, %v150_v13 }
 0x143   :  { %1530 = vmatprep.subr.mxu1 %v1703_v6 }
 0x145   :  { %1528 = vmatmul.mubr.msk.f32.vlgmr.msra.gmra.mxu1 %vm151_vm2, %v1816_v11  ;;  %v240_v14 = vpop.permute.xlu0 %239  ;;  %v329_v15 = vpop.permute.xlu1 %328 }
 0x146   :  { %1531 = vmatpush3.xpose.msk.msra.mxu1 %vm151_vm2, %v240_v14  ;;  %1532 = vmatprep.mubr.msk.f32.mxu1 %vm1704_vm1, %v1703_v6 }
 0x147   :  { %1535 = vmatprep.subr.mxu1 %v1703_v6 }
 0x149   :  { %1533 = vmatmul.mubr.msk.f32.vlgmr.msra.gmra.mxu1 %vm151_vm2, %v238_v12  ;;  %v327_v16 = vpop.permute.xlu0 %326  ;;  %v418_v17 = vpop.permute.xlu1 %417 }
 0x14a   :  { %1536 = vmatpush3.xpose.msk.msra.mxu1 %vm151_vm2, %v329_v15  ;;  %1537 = vmatprep.mubr.msk.f32.mxu1 %vm1704_vm1, %v1703_v6 }
 0x14b   :  { %1540 = vmatprep.subr.mxu1 %v1703_v6 }
 0x14d   :  { %1538 = vmatmul.mubr.msk.f32.vlgmr.msra.gmra.mxu1 %vm151_vm2, %v327_v16  ;;  %v416_v18 = vpop.permute.xlu0 %415 }
 0x14e   :  { %1541 = vmatpush3.xpose.msk.msra.mxu1 %vm151_vm2, %v418_v17  ;;  %1542 = vmatprep.mubr.msk.f32.mxu1 %vm1704_vm1, %v1703_v6 }
 0x14f   :  { %1556 = vmatprep.subr.mxu1 %v1703_v6 }
 0x151   :  { %1543 = vmatmul.mubr.msk.f32.vlgmr.msra.gmra.mxu1 %vm151_vm2, %v416_v18 }
 0x152   :  { %1558 = vmatprep.mubr.msk.f32.mxu1 %vm1704_vm1, %v1703_v6 }
 0x205   :  { %v222_v19 = vpop.f32.mrf.mxu1 }
 0x206   :  { %v226_v25 = vsel %vm151_vm2, %v222_v19, -inf }
 0x207   :  { %v1529_v20 = vpop.f32.mrf.mxu1 }
 0x209   :  { %v311_v21 = vpop.f32.mrf.mxu1 }
 0x20a   :  { %v315_v22 = vsel %vm151_vm2, %v311_v21, -inf }
 0x20b   :  { %316 = vmax.xlane.f32.xlu1 %v315_v22  ;;  %v1534_v23 = vpop.f32.mrf.mxu1 }
 0x20d   :  { %v400_v24 = vpop.f32.mrf.mxu1 }
 0x20e   :  { %v404_v26 = vsel %vm151_vm2, %v400_v24, -inf }
 0x20f   :  { %227 = vmax.xlane.f32.xlu1 %v226_v25  ;;  %405 = vmax.xlane.f32.xlu0 %v404_v26  ;;  %v1539_v27 = vpop.f32.mrf.mxu1 }
 0x211   :  { %v489_v28 = vpop.f32.mrf.mxu1 }
 0x212   :  { %v493_v29 = vsel %vm151_vm2, %v489_v28, -inf }
 0x213   :  { %494 = vmax.xlane.f32.xlu0 %v493_v29  ;;  %v1544_v30 = vpop.f32.mrf.mxu1 }
 0x294   :  { %v317_v31 = vpop.xlane.xlu1 %316 }
 0x295   :  { %v318_v32 = vsub.f32 %v311_v21, %v317_v31 }
 0x297   :  { %v319_v33 = vmul.f32 1.442695, %v318_v32 }
 0x298   :  { %v228_v34 = vpop.xlane.xlu1 %227  ;;  %v406_v35 = vpop.xlane.xlu0 %405 }
 0x299   :  { %1641 = vpow2.f32 %v319_v33  ;;  %v229_v36 = vsub.f32 %v222_v19, %v228_v34  ;;  %v407_v37 = vsub.f32 %v400_v24, %v406_v35 }
 0x29b   :  { %v408_v38 = vmul.f32 1.442695, %v407_v37  ;;  %v230_v39 = vmul.f32 1.442695, %v229_v36 }
 0x29c   :  { %v495_v40 = vpop.xlane.xlu0 %494 }
 0x29d   :  { %v496_v41 = vsub.f32 %v489_v28, %v495_v40  ;;  %1643 = vpow2.f32 %v408_v38 }
 0x29e   :  { %1645 = vpow2.f32 %v230_v39 }
 0x29f   :  { %v497_v42 = vmul.f32 1.442695, %v496_v41 }
 0x2a1   :  { %1647 = vpow2.f32 %v497_v42 }
 0x2a6   :  { %v1642_v43 = vpop.eup %1641 }
 0x2a7   :  { %v321_v44 = vsel %vm151_vm2, %v1642_v43, 0.0 }
 0x2a8   :  { %322 = vadd.xlane.f32.xlu0 %v321_v44 }
 0x2aa   :  { %v1644_v45 = vpop.eup %1643 }
 0x2ab   :  { %v410_v46 = vsel %vm151_vm2, %v1644_v45, 0.0  ;;  %v1859_v47 = vpop.eup %1645 }
 0x2ac   :  { %411 = vadd.xlane.f32.xlu1 %v410_v46  ;;  %v232_v50 = vsel %vm151_vm2, %v1859_v47, 0.0 }
 0x2ae   :  { %v1648_v48 = vpop.eup %1647 }
 0x2af   :  { %v499_v49 = vsel %vm151_vm2, %v1648_v48, 0.0 }
 0x2b0   :  { %500 = vadd.xlane.f32.xlu0 %v499_v49  ;;  %233 = vadd.xlane.f32.xlu1 %v232_v50 }
 0x2c1   :  { %602 = vrot.lane.b32.xlu1 %v1814_v9, %s1706_s30 }
 0x2c5   :  { %691 = vrot.lane.b32.xlu1 %v1814_v9, %s1708_s13 }
 0x2c6   :  { %521 = vrot.lane.b32.xlu0 %v1816_v11, %s1712_s16 }
 0x2c9   :  { %689 = vrot.lane.b32.xlu1 %v1814_v9, %s1705_s29 }
 0x331   :  { %v323_v52 = vpop.xlane.xlu0 %322 }
 0x332   :  { %1649 = vrcp.f32 %v323_v52 }
 0x335   :  { %v412_v54 = vpop.xlane.xlu1 %411 }
 0x336   :  { %1651 = vrcp.f32 %v412_v54 }
 0x339   :  { %v501_v55 = vpop.xlane.xlu0 %500  ;;  %v234_v56 = vpop.xlane.xlu1 %233 }
 0x33a   :  { %1653 = vrcp.f32 %v501_v55 }
 0x33b   :  { %1655 = vrcp.f32 %v234_v56 }
 0x33d   :  { %v522_v58 = vpop.permute.xlu0 %521  ;;  %v603_v60 = vpop.permute.xlu1 %602 }
 0x33e   :  { %1546 = vmatpush3.msk.msra.mxu0 %vm1879_vm7, %v522_v58  ;;  %1557 = vmatpush3.xpose.msk.msra.mxu1 %vm151_vm2, %v603_v60 }
 0x33f   :  { %v1650_v61 = vpop.eup %1649  ;;  %1547 = vmatprep.subr.mxu0 %v1703_v6  ;;  %1561 = vmatprep.subr.mxu1 %v1703_v6 }
 0x340   :  { %1548 = vmatpush3.msk.msra.mxu0 %vm1883_vm8, %v522_v58  ;;  %v325_v62 = vmul.f32 %v1650_v61, %v1642_v43 }
 0x341   :  { %1549 = vmatprep.subr.mxu0 %v1703_v6  ;;  %1559 = vmatmul.mubr.msk.f32.vlgmr.msra.gmra.mxu1 %vm151_vm2, %v1814_v9  ;;  %v692_v0 = vpop.permute.xlu1 %691 }
 0x342   :  { %505 = vrot.lane.b32.xlu1 %v325_v62, %s1713_s17  ;;  %1562 = vmatpush3.xpose.msk.msra.mxu1 %vm151_vm2, %v692_v0 }
 0x343   :  { %1550 = vmatpush3.msk.msra.mxu0 %vm1896_vm11, %v522_v58  ;;  %v1652_v1 = vpop.eup %1651  ;;  %1563 = vmatprep.mubr.msk.f32.mxu1 %vm1704_vm1, %v1703_v6 }
 0x344   :  { %1551 = vmatprep.subr.mxu0 %v1703_v6  ;;  %v414_v3 = vmul.f32 %v1652_v1, %v1644_v45  ;;  %1571 = vmatprep.subr.mxu1 %v1703_v6 }
 0x345   :  { %1552 = vmatpush3.msk.msra.mxu0 %vm137_vm12, %v522_v58  ;;  %v690_v4 = vpop.permute.xlu1 %689 }
 0x346   :  { %869 = vrot.lane.b32.xlu1 %v1814_v9, %s1709_s2  ;;  %1566 = vmatprep.subr.mxu0 %v1703_v6 }
 0x347   :  { %v1654_v7 = vpop.eup %1653  ;;  %1564 = vmatmul.mubr.msk.f32.vlgmr.msra.gmra.mxu1 %vm151_vm2, %v690_v4  ;;  %509 = vrot.lane.b32.xlu0 %v414_v3, %s1714_s18 }
 0x348   :  { %v503_v8 = vmul.f32 %v1654_v7, %v1648_v48  ;;  %1573 = vmatprep.mubr.msk.f32.mxu1 %vm1704_vm1, %v1703_v6  ;;  %v1656_v11 = vpop.eup %1655 }
 0x349   :  { %v236_v14 = vmul.f32 %v1656_v11, %v1859_v47 }
 0x34a   :  { %867 = vrot.lane.b32.xlu1 %v1814_v9, %s1711_s15 }
 0x34b   :  { %513 = vrot.lane.b32.xlu0 %v503_v8, %s1715_s19 }
 0x34f   :  { %780 = vrot.lane.b32.xlu0 %v1814_v9, %s1707_s12 }
 0x353   :  { %778 = vrot.lane.b32.xlu0 %v1814_v9, %s1710_s14  ;;  %s1717_s14 = smov [#allocation2]  }
 0x354   :  { %s1412_s15 = sshll.u32 %s1717_s14, 4  ;;  %s1413_s15 = int_to_ptr.vmem [resolvable:$true] %s1412_s15 }
 0x355   :  { %p1686_p1 = scmp.lt.s32.totalorder %s1413_s15, %s1413_s15 }
 0x3b4   :  { %v506_v10 = vpop.permute.xlu1 %505 }
 0x3b5   :  { %v516_v15 = vsel %vm151_vm2, %v236_v14, %v506_v10 }
 0x3b8   :  { %v870_v12 = vpop.permute.xlu1 %869 }
 0x3b9   :  { %v510_v13 = vpop.permute.xlu0 %509  ;;  %1572 = vmatpush3.xpose.msk.msra.mxu1 %vm151_vm2, %v870_v12 }
 0x3ba   :  { %v518_v17 = vsel %vm517_vm13, %v516_v15, %v510_v13 }
 0x3bc   :  { %v868_v16 = vpop.permute.xlu1 %867 }
 0x3bd   :  { %v514_v18 = vpop.permute.xlu0 %513  ;;  %1574 = vmatmul.mubr.msk.f32.vlgmr.msra.gmra.mxu1 %vm151_vm2, %v868_v16 }
 0x3be   :  { %v520_v19 = vsel %vm519_vm14, %v518_v17, %v514_v18 }
 0x3bf   :  { %1554 = vmatmul.mubr.msk.f32.vlgmr.msra.gmra.mxu0 %vm52_vm0, %v520_v19 }
 0x3c0   :  { %1568 = vmatprep.mubr.msk.f32.mxu0 %vm1704_vm1, %v1703_v6 }
 0x3c1   :  { %v781_v20 = vpop.permute.xlu0 %780 }
 0x3c2   :  { %1567 = vmatpush3.xpose.msk.msra.mxu0 %vm151_vm2, %v781_v20  ;;  %v1452_v20 = vld [vmem:[%s2077_s4] ss:$0 sm:$0xff] }
 0x3c3   :  { %1576 = vmatprep.subr.mxu0 %v1703_v6 }
 0x3c5   :  { %v779_v21 = vpop.permute.xlu0 %778 }
 0x3c6   :  { %1569 = vmatmul.mubr.msk.f32.vlgmr.msra.gmra.mxu0 %vm151_vm2, %v779_v21 }
 0x3c7   :  { %1584 = vmatprep.mubr.msk.f32.mxu0 %vm1704_vm1, %v1703_v6 }
 0x401   :  { %v674_v22 = vpop.f32.mrf.mxu1 }
 0x402   :  { %v678_v32 = vsel %vm151_vm2, %v674_v22, -inf }
 0x403   :  { %v1560_v23 = vpop.f32.mrf.mxu1 }
 0x407   :  { %v763_v24 = vpop.f32.mrf.mxu1 }
 0x408   :  { %v767_v25 = vsel %vm151_vm2, %v763_v24, -inf }
 0x409   :  { %v1565_v26 = vpop.f32.mrf.mxu1  ;;  %768 = vmax.xlane.f32.xlu0 %v767_v25 }
 0x47d   :  { %v941_v27 = vpop.f32.mrf.mxu1 }
 0x47e   :  { %v945_v28 = vsel %vm151_vm2, %v941_v27, -inf }
 0x47f   :  { %v597_v29 = vpop.f32.mrf.mxu0  ;;  %v1575_v30 = vpop.f32.mrf.mxu1  ;;  %946 = vmax.xlane.f32.xlu0 %v945_v28 }
 0x480   :  { %1595 = vmatprep.mubr.msk.f32.mxu1 %vm52_vm0, %v597_v29 }
 0x481   :  { %v1555_v31 = vpop.f32.mrf.mxu0 }
 0x483   :  { %679 = vmax.xlane.f32.xlu0 %v678_v32 }
 0x486   :  { %v852_v33 = vpop.f32.mrf.mxu0 }
 0x487   :  { %v856_v34 = vsel %vm151_vm2, %v852_v33, -inf }
 0x488   :  { %857 = vmax.xlane.f32.xlu1 %v856_v34  ;;  %v1570_v35 = vpop.f32.mrf.mxu0 }
 0x492   :  { %v769_v36 = vpop.xlane.xlu0 %768 }
 0x493   :  { %v770_v37 = vsub.f32 %v763_v24, %v769_v36 }
 0x495   :  { %v771_v38 = vmul.f32 1.442695, %v770_v37 }
 0x497   :  { %1657 = vpow2.f32 %v771_v38  ;;  %v1266_v38 = vld [vmem:[%s2080_s7 + $0x50] sm:$0xff] }
 0x4a4   :  { %v1658_v39 = vpop.eup %1657 }
 0x4a5   :  { %v773_v40 = vsel %vm151_vm2, %v1658_v39, 0.0 }
 0x4a6   :  { %774 = vadd.xlane.f32.xlu1 %v773_v40  ;;  %v1264_v40 = vld [vmem:[%s2080_s7 + $0x40] sm:$0xff] }
 0x508   :  { %v947_v41 = vpop.xlane.xlu0 %946 }
 0x509   :  { %v948_v42 = vsub.f32 %v941_v27, %v947_v41  ;;  %v1263_v41 = vld [vmem:[%s2080_s7 + $0x38] sm:$0xff] }
 0x50b   :  { %v949_v43 = vmul.f32 1.442695, %v948_v42  ;;  %v1262_v42 = vld [vmem:[%s2080_s7 + $0x30] sm:$0xff] }
 0x50c   :  { %v680_v44 = vpop.xlane.xlu0 %679 }
 0x50d   :  { %1659 = vpow2.f32 %v949_v43  ;;  %v681_v45 = vsub.f32 %v674_v22, %v680_v44 }
 0x50f   :  { %v682_v48 = vmul.f32 1.442695, %v681_v45 }
 0x511   :  { %v858_v46 = vpop.xlane.xlu1 %857 }
 0x512   :  { %v859_v47 = vsub.f32 %v852_v33, %v858_v46 }
 0x514   :  { %v860_v49 = vmul.f32 1.442695, %v859_v47 }
 0x516   :  { %1661 = vpow2.f32 %v860_v49  ;;  %v1261_v49 = vld [vmem:[%s2080_s7 + $0x28] sm:$0xff] }
 0x517   :  { %1663 = vpow2.f32 %v682_v48 }
 0x51a   :  { %v1660_v50 = vpop.eup %1659 }
 0x51b   :  { %v951_v52 = vsel %vm151_vm2, %v1660_v50, 0.0 }
 0x51c   :  { %952 = vadd.xlane.f32.xlu1 %v951_v52  ;;  %v1191_v52 = vshrl.u32 %v134_v51, 7  ;;  %v1456_v51 = vld [vmem:[%s2079_s6] ss:$0 sm:$0xff] }
 0x51e   :  { %vm1230_vm15 = vcmp.lt.s32.totalorder %v1191_v52, 7  ;;  %vm1221_vm3 = vcmp.lt.s32.totalorder %v1191_v52, 1 }
 0x523   :  { %v1662_v54 = vpop.eup %1661 }
 0x524   :  { %v862_v55 = vsel %vm151_vm2, %v1662_v54, 0.0  ;;  %v1664_v56 = vpop.eup %1663 }
 0x525   :  { %863 = vadd.xlane.f32.xlu0 %v862_v55  ;;  %v684_v58 = vsel %vm151_vm2, %v1664_v56, 0.0  ;;  %v1258_v55 = vld [vmem:[%s2080_s7 + $0x10] sm:$0xff] }
 0x529   :  { %685 = vadd.xlane.f32.xlu0 %v684_v58  ;;  %v1455_v58 = vld [vmem:[%s2078_s5] ss:$0 sm:$0xff]  ;;  %s1716_s5 = smov 32  }
 0x52d   :  { %971 = vrot.lane.b32.xlu1 %v1814_v9, %s1712_s16  ;;  %v1054_v9 = vld [vmem:[%s2076_s3 + $0x18] sm:$0xff] }
 0x52e   :  { %1587 = vmatprep.subr.mxu1 %v1054_v9 }
 0x52f   :  { %v775_v60 = vpop.xlane.xlu1 %774  ;;  %1588 = vmatpush3.msra.mxu1 %v1054_v9 }
 0x530   :  { %1665 = vrcp.f32 %v775_v60  ;;  %1589 = vmatprep.subr.mxu1 %v1053_v57 }
 0x531   :  { %1590 = vmatpush3.msra.mxu1 %v1053_v57 }
 0x532   :  { %1591 = vmatprep.subr.mxu1 %v1052_v59 }
 0x533   :  { %1592 = vmatpush3.msra.mxu1 %v1052_v59  ;;  %v1197_v59 = vand.u32 7, %v1191_v52 }
 0x535   :  { %vm1226_vm1 = vcmp.le.s32.totalorder %v1197_v59, 6 }
 0x53d   :  { %v1666_v61 = vpop.eup %1665 }
 0x53e   :  { %v777_v62 = vmul.f32 %v1666_v61, %v1658_v39  ;;  %v1265_v39 = vld [vmem:[%s2080_s7 + $0x48] sm:$0xff]  ;;  %v1192_v61 = vadd.s32 8, %v1191_v52 }
 0x540   :  { %957 = vrot.lane.b32.xlu0 %v777_v62, %s1713_s17  ;;  %v1257_v62 = vld [vmem:[%s2080_s7 + $0x8] sm:$0xff] }
 0x5a5   :  { %v953_v0 = vpop.xlane.xlu1 %952 }
 0x5a9   :  { %v972_v1 = vpop.permute.xlu1 %971 }
 0x5aa   :  { %1577 = vmatpush3.msk.msra.mxu0 %vm1879_vm7, %v972_v1  ;;  %vm1275_vm7 = vcmask 785408  }
 0x5ab   :  { %1578 = vmatprep.subr.mxu0 %v1703_v6 }
 0x5ac   :  { %1579 = vmatpush3.msk.msra.mxu0 %vm1883_vm8, %v972_v1 }
 0x5ad   :  { %1580 = vmatprep.subr.mxu0 %v1703_v6 }
 0x5ae   :  { %v864_v3 = vpop.xlane.xlu0 %863  ;;  %1581 = vmatpush3.msk.msra.mxu0 %vm1896_vm11, %v972_v1 }
 0x5af   :  { %1667 = vrcp.f32 %v864_v3  ;;  %1582 = vmatprep.subr.mxu0 %v1703_v6  ;;  %v1051_v6 = vld [vmem:[%s2076_s3] sm:$0xff] }
 0x5b0   :  { %1583 = vmatpush3.msk.msra.mxu0 %vm137_vm12, %v972_v1  ;;  %1669 = vrcp.f32 %v953_v0  ;;  %1593 = vmatprep.subr.mxu1 %v1051_v6  ;;  %v1256_v1 = vld [vmem:[%s2080_s7] sm:$0xff] }
 0x5b1   :  { %1594 = vmatpush3.msra.mxu1 %v1051_v6  ;;  %v1204_v6 = vand.u32 7, %v1192_v61 }
 0x5b2   :  { %v686_v8 = vpop.xlane.xlu0 %685 }
 0x5b3   :  { %1671 = vrcp.f32 %v686_v8  ;;  %vm2040_vm4 = vcmp.ge.s32.totalorder %v1204_v6, 1  ;;  %vm1227_vm5 = vcmp.le.s32.totalorder %v1204_v6, 6 }
 0x5b6   :  { %v958_v13 = vpop.permute.xlu0 %957 }
 0x5bc   :  { %v1668_v53 = vpop.eup %1667 }
 0x5bd   :  { %v866_v63 = vmul.f32 %v1668_v53, %v1662_v54  ;;  %v1670_v4 = vpop.eup %1669  ;;  %v1259_v54 = vld [vmem:[%s2080_s7 + $0x18] sm:$0xff] }
 0x5be   :  { %v955_v7 = vmul.f32 %v1670_v4, %v1660_v50  ;;  %v1260_v50 = vld [vmem:[%s2080_s7 + $0x20] sm:$0xff] }
 0x5bf   :  { %961 = vrot.lane.b32.xlu1 %v866_v63, %s1714_s18  ;;  %s1681_s18 = scalar_lea.vmem %s1413_s15, 256 }
 0x5c0   :  { %v1672_v10 = vpop.eup %1671  ;;  %p1682_p0 = scmp.ne.s32.totalorder %s1413_s15, %s1681_s18  ;;  %p1687_p2 = scmp.lt.s32.totalorder %s1681_s18, %s1681_s18 }
 0x5c1   :  { %v688_v11 = vmul.f32 %v1672_v10, %v1664_v56 }
 0x5c2   :  { %p1688_p3 = por %p1687_p2, %p1686_p1 }
 0x5c3   :  { %965 = vrot.lane.b32.xlu1 %v955_v7, %s1715_s19  ;;  %v968_v14 = vsel %vm151_vm2, %v688_v11, %v958_v13  ;;  %vm2036_vm2 = vcmp.ge.s32.totalorder %v1197_v59, 1 }
 0x5c4   :  { %p1689_p4 = pnand %p1688_p3, %p1682_p0 }
 0x631   :  { %v962_v12 = vpop.permute.xlu1 %961 }
 0x632   :  { %v969_v15 = vsel %vm517_vm13, %v968_v14, %v962_v12 }
 0x635   :  { %v966_v16 = vpop.permute.xlu1 %965 }
 0x636   :  { %v970_v17 = vsel %vm519_vm14, %v969_v15, %v966_v16 }
 0x637   :  { %1585 = vmatmul.mubr.msk.f32.vlgmr.msra.gmra.mxu0 %vm52_vm0, %v970_v17 }
 0x6f7   :  { %v1047_v18 = vpop.f32.mrf.mxu0 }
 0x6f8   :  { %1596 = vmatmul.mubr.msk.f32.vlgmr.msra.gmra.mxu1 %vm52_vm0, %v1047_v18 }
 0x6f9   :  { %v1586_v19 = vpop.f32.mrf.mxu0 }
 0x7b8   :  { %v1597_v21 = vpop.f32.mrf.mxu1 }
 0x7b9   :  { %v1140_v22 = vadd.f32 %v1597_v21, %v1452_v20 }
 0x7ba   :  { %v1134_v23 = vpop.f32.mrf.mxu1 }
 0x7bb   :  { %v1135_v24 = vadd.f32 %v1452_v20, %v1134_v23  ;;  %v1144_v25 = vadd.f32 %v1140_v22, %v1801_v5 }
 0x7bd   :  { %v1150_v26 = vsel %vm52_vm0, %v1144_v25, 0.0  ;;  %v1143_v27 = vadd.f32 %v1135_v24, %v1788_v2  ;;  %v1267_v2 = vld [vmem:[%s2080_s7 + $0x58] sm:$0xff] }
 0x7be   :  { %1151 = vadd.xlane.f32.xlu1 %v1150_v26  ;;  %1598 = vmatprep.subr.mxu0 %v1267_v2 }
 0x7bf   :  { %v1147_v28 = vsel %vm52_vm0, %v1143_v27, 0.0  ;;  %1599 = vmatpush3.msra.mxu0 %v1267_v2 }
 0x7c0   :  { %1148 = vadd.xlane.f32.xlu0 %v1147_v28  ;;  %1600 = vmatprep.subr.mxu0 %v1266_v38 }
 0x7c1   :  { %1601 = vmatpush3.msra.mxu0 %v1266_v38 }
 0x7c2   :  { %1602 = vmatprep.subr.mxu0 %v1265_v39 }
 0x7c3   :  { %1603 = vmatpush3.msra.mxu0 %v1265_v39 }
 0x7c4   :  { %1604 = vmatprep.subr.mxu0 %v1264_v40 }
 0x7c5   :  { %1605 = vmatpush3.msra.mxu0 %v1264_v40 }
 0x7c6   :  { %1606 = vmatprep.subr.mxu0 %v1263_v41 }
 0x7c7   :  { %1607 = vmatpush3.msra.mxu0 %v1263_v41 }
 0x7c8   :  { %1608 = vmatprep.subr.mxu0 %v1262_v42 }
 0x7c9   :  { %1609 = vmatpush3.msra.mxu0 %v1262_v42 }
 0x7ca   :  { %1610 = vmatprep.subr.mxu0 %v1261_v49 }
 0x7cb   :  { %1611 = vmatpush3.msra.mxu0 %v1261_v49 }
 0x7cc   :  { %1612 = vmatprep.subr.mxu0 %v1260_v50 }
 0x7cd   :  { %1613 = vmatpush3.msra.mxu0 %v1260_v50 }
 0x7ce   :  { %1614 = vmatprep.subr.mxu0 %v1259_v54 }
 0x7cf   :  { %1615 = vmatpush3.msra.mxu0 %v1259_v54 }
 0x7d0   :  { %1616 = vmatprep.subr.mxu0 %v1258_v55 }
 0x7d1   :  { %1617 = vmatpush3.msra.mxu0 %v1258_v55 }
 0x7d2   :  { %1618 = vmatprep.subr.mxu0 %v1257_v62 }
 0x7d3   :  { %1619 = vmatpush3.msra.mxu0 %v1257_v62 }
 0x7d4   :  { %1620 = vmatprep.subr.mxu0 %v1256_v1 }
 0x7d5   :  { %1621 = vmatpush3.msra.mxu0 %v1256_v1 }
 0x847   :  { %v1152_v29 = vpop.xlane.xlu1 %1151 }
 0x848   :  { %v1155_v30 = vmul.f32 0.03125, %v1152_v29  ;;  %v1457_v29 = vld [vmem:[%s2081_s8] ss:$0 sm:$0xff] }
 0x849   :  { %v1149_v31 = vpop.xlane.xlu0 %1148 }
 0x84a   :  { %v1154_v32 = vmul.f32 0.03125, %v1149_v31  ;;  %v1157_v33 = vsub.f32 %v1144_v25, %v1155_v30 }
 0x84c   :  { %v1156_v34 = vsub.f32 %v1143_v27, %v1154_v32  ;;  %v1159_v37 = vmul.f32 %v1157_v33, %v1157_v33 }
 0x84e   :  { %v1158_v35 = vmul.f32 %v1156_v34, %v1156_v34  ;;  %v1163_v5 = vsel %vm52_vm0, %v1159_v37, 0.0 }
 0x850   :  { %v1160_v36 = vsel %vm52_vm0, %v1158_v35, 0.0 }
 0x851   :  { %1161 = vadd.xlane.f32.xlu0 %v1160_v36 }
 0x855   :  { %1164 = vadd.xlane.f32.xlu0 %v1163_v5 }
 0x8da   :  { %v1162_v43 = vpop.xlane.xlu0 %1161 }
 0x8db   :  { %v1166_v44 = vmul.f32 0.03125, %v1162_v43 }
 0x8dd   :  { %v1168_v45 = vadd.f32 1e-05, %v1166_v44 }
 0x8de   :  { %v1165_v46 = vpop.xlane.xlu0 %1164 }
 0x8df   :  { %1673 = vrsqrt.f32 %v1168_v45  ;;  %v1167_v47 = vmul.f32 0.03125, %v1165_v46 }
 0x8e1   :  { %v1169_v48 = vadd.f32 1e-05, %v1167_v47 }
 0x8e3   :  { %1675 = vrsqrt.f32 %v1169_v48 }
 0x8ec   :  { %v1674_v56 = vpop.eup %1673 }
 0x8ed   :  { %v1172_v60 = vmul.f32 %v1674_v56, %v1156_v34 }
 0x8ef   :  { %v1180_v0 = vmul.f32 %v1455_v58, %v1172_v60 }
 0x8f0   :  { %v1676_v3 = vpop.eup %1675 }
 0x8f1   :  { %v1188_v9 = vadd.f32 %v1456_v51, %v1180_v0  ;;  %v1173_v57 = vmul.f32 %v1676_v3, %v1157_v33 }
 0x8f3   :  { %1237 = vrot.lane.b32.xlu1 %v1188_v9, %s1716_s5  ;;  %v1181_v53 = vmul.f32 %v1455_v58, %v1173_v57  ;;  %v1228_v8 = vrot.slane %v1188_v9, 1  ;;  %v1219_v11 = vrot.slane %v1188_v9, 7  ;;  %v1460_v58 = vld [vmem:[%s2082_s9] ss:$0 sm:$0xff] }
 0x8f5   :  { %v1189_v63 = vadd.f32 %v1456_v51, %v1181_v53  ;;  %v1461_v51 = vld [vmem:[%s2083_s10] ss:$0 sm:$0xff] }
 0x8f7   :  { %1239 = vrot.lane.b32.xlu0 %v1189_v63, %s1716_s5  ;;  %v1229_v10 = vrot.slane %v1189_v63, 1  ;;  %v1220_v12 = vrot.slane %v1189_v63, 7 }
 0x8f9   :  { %v1231_v13 = vsel %vm1230_vm15, %v1228_v8, %v1229_v10  ;;  %v1223_v14 = vsel %vm1221_vm3, %v1220_v12, %v1219_v11  ;;  %v1222_v15 = vsel %vm1221_vm3, %v1219_v11, %v1220_v12  ;;  %v1232_v19 = vsel %vm1230_vm15, %v1229_v10, %v1228_v8 }
 0x8fa   :  { %v1233_v16 = vsel %vm1226_vm1, %v1231_v13, 0.0  ;;  %v1224_v17 = vsel %vm2036_vm2, %v1223_v14, 0.0  ;;  %v1225_v18 = vsel %vm2040_vm4, %v1222_v15, 0.0  ;;  %v1234_v20 = vsel %vm1227_vm5, %v1232_v19, 0.0 }
 0x8fb   :  { %1245 = vrot.lane.b32.xlu1 %v1233_v16, %s1712_s16 }
 0x8ff   :  { %1247 = vrot.lane.b32.xlu1 %v1234_v20, %s1712_s16 }
 0x965   :  { %v1238_v21 = vpop.permute.xlu1 %1237 }
 0x966   :  { %v1251_v22 = vsel %vm52_vm0, %v1224_v17, %v1238_v21 }
 0x969   :  { %v1240_v24 = vpop.permute.xlu0 %1239 }
 0x96a   :  { %v1252_v26 = vsel %vm52_vm0, %v1225_v18, %v1240_v24 }
 0x96d   :  { %v1246_v23 = vpop.permute.xlu1 %1245 }
 0x96e   :  { %v1254_v25 = vsel %vm1253_vm6, %v1251_v22, %v1246_v23 }
 0x96f   :  { %1622 = vmatprep.mubr.msk.f32.mxu0 %vm1275_vm7, %v1254_v25 }
 0x971   :  { %v1248_v27 = vpop.permute.xlu1 %1247 }
 0x972   :  { %v1255_v28 = vsel %vm1253_vm6, %v1252_v26, %v1248_v27 }
 0x973   :  { %1623 = vmatmul.mubr.msk.f32.vlgmr.msra.gmra.mxu0 %vm1275_vm7, %v1255_v28 }
 0xa33   :  { %v1624_v30 = vpop.f32.mrf.mxu0 }
 0xa34   :  { %v1354_v31 = vadd.f32 %v1624_v30, %v1457_v29 }
 0xa35   :  { %v1348_v32 = vpop.f32.mrf.mxu0 }
 0xa36   :  { %v1358_v33 = vmax.f32 %v1354_v31, 0.0  ;;  %v1349_v34 = vadd.f32 %v1457_v29, %v1348_v32 }
 0xa38   :  { %v1357_v35 = vmax.f32 %v1349_v34, 0.0  ;;  %v1360_v36 = vadd.f32 %v1358_v33, %v1189_v63 }
 0xa3a   :  { %v1366_v37 = vsel %vm52_vm0, %v1360_v36, 0.0  ;;  %v1359_v5 = vadd.f32 %v1357_v35, %v1188_v9 }
 0xa3b   :  { %1367 = vadd.xlane.f32.xlu1 %v1366_v37 }
 0xa3c   :  { %v1363_v2 = vsel %vm52_vm0, %v1359_v5, 0.0 }
 0xa3d   :  { %1364 = vadd.xlane.f32.xlu0 %v1363_v2 }
 0xac4   :  { %v1368_v38 = vpop.xlane.xlu1 %1367 }
 0xac5   :  { %v1370_v39 = vmul.f32 0.03125, %v1368_v38 }
 0xac6   :  { %v1365_v40 = vpop.xlane.xlu0 %1364 }
 0xac7   :  { %v1369_v41 = vmul.f32 0.03125, %v1365_v40  ;;  %v1372_v42 = vsub.f32 %v1360_v36, %v1370_v39 }
 0xac9   :  { %v1371_v43 = vsub.f32 %v1359_v5, %v1369_v41  ;;  %v1374_v46 = vmul.f32 %v1372_v42, %v1372_v42 }
 0xacb   :  { %v1373_v44 = vmul.f32 %v1371_v43, %v1371_v43  ;;  %v1378_v47 = vsel %vm52_vm0, %v1374_v46, 0.0 }
 0xacd   :  { %v1375_v45 = vsel %vm52_vm0, %v1373_v44, 0.0 }
 0xace   :  { %1376 = vadd.xlane.f32.xlu0 %v1375_v45 }
 0xad2   :  { %1379 = vadd.xlane.f32.xlu0 %v1378_v47 }
 0xb57   :  { %v1377_v48 = vpop.xlane.xlu0 %1376 }
 0xb58   :  { %v1381_v49 = vmul.f32 0.03125, %v1377_v48 }
 0xb5a   :  { %v1383_v50 = vadd.f32 1e-05, %v1381_v49 }
 0xb5b   :  { %v1380_v52 = vpop.xlane.xlu0 %1379 }
 0xb5c   :  { %1677 = vrsqrt.f32 %v1383_v50  ;;  %v1382_v54 = vmul.f32 0.03125, %v1380_v52 }
 0xb5e   :  { %v1384_v55 = vadd.f32 1e-05, %v1382_v54 }
 0xb60   :  { %1679 = vrsqrt.f32 %v1384_v55 }
 0xb69   :  { %v1678_v56 = vpop.eup %1677 }
 0xb6a   :  { %v1387_v60 = vmul.f32 %v1678_v56, %v1371_v43 }
 0xb6c   :  { %v1395_v61 = vmul.f32 %v1460_v58, %v1387_v60 }
 0xb6d   :  { %v1680_v62 = vpop.eup %1679 }
 0xb6e   :  { %v1388_v0 = vmul.f32 %v1680_v62, %v1372_v42  ;;  %v1403_v1 = vadd.f32 %v1461_v51, %v1395_v61 }
 0xb70   :  { %v1396_v3 = vmul.f32 %v1460_v58, %v1388_v0  ;;  %1405 = vst.msk [vmem:[#allocation2] sm:$0xff] %vm52_vm0, %v1403_v1 }
 0xb72   :  { %v1404_v9 = vadd.f32 %v1461_v51, %v1396_v3 }
 0xb74   :  { %1406 = vst.msk [vmem:[#allocation2 + $0x8] sm:$0xff] %vm52_vm0, %v1404_v9 }
 0xb75   :  { %1692 = shalt.err (!%p1689_p4)
}
 0xb76   :  { %s1718_s9 = smov 128  }
 0xb77   :  { %1418 = dma.vmem_to_hbm [thread:$0]  %s1413_s15, 256, %s2084_s11, [#allocation3], %s1718_s9, %s1718_s9, %s1713_s17  }
 0xb78   :  { %1701 = dma.done.wait [#allocation3], 256  }
 0xb79   :  { %1702 = vsyncadd [#allocation3], 4294967040 }
 0xb7a   :  { %1422 = vsyncpa [#allocation3], 1 }

</bundles_post_ra>
